<compile_context>
chip_gen: v7x
topology: tpu7x:2x2x1
jax: 0.10.0
libtpu: 0.0.40
codegen_flags: <defaults>
</compile_context>

<pallas_src>
import functools

import numpy as np
import jax
import jax.numpy as jnp
from jax.experimental import pallas as pl
from jax.experimental.pallas import tpu as pltpu


# ---------------------------------------------------------------------------
# Focal-loss math specialized for binary / one-hot targets.
# ---------------------------------------------------------------------------
def _binary_focal(x, tpos, alpha, gamma):
    """Elementwise sigmoid focal loss for {0,1} targets given as a bool mask.

    Returns (loss, sigmoid(x)).  The probability uses an exact reciprocal
    (it feeds the modulating factor, alpha weighting and the dice loss), and
    binary targets let us replace the generic a*t + b*(1-t) blends with
    single selects (fewer VALU ops in the VALU-bound elementwise phase)."""
    ax = jnp.abs(x)
    e = jnp.exp(-ax)
    p = jnp.where(x >= 0, 1.0, e) / (1.0 + e)                       # sigmoid(x), exact
    ce = jnp.maximum(x, 0.0) - jnp.where(tpos, x, 0.0) + jnp.log1p(e)
    one_minus_pt = jnp.where(tpos, 1.0 - p, p)
    if gamma == 2:
        mod = one_minus_pt * one_minus_pt
    else:
        # TODO(synk): generic non-integer gamma path (exp/log on EUP); unused here.
        mod = jnp.power(jnp.maximum(one_minus_pt, 1e-12), gamma)
    loss = ce * mod
    if alpha >= 0:
        loss = jnp.where(tpos, alpha, 1.0 - alpha) * loss
    return loss, p


# ---------------------------------------------------------------------------
# Fused criterion kernel: class focal + box L1/GIoU + mask focal + dice.
# Output lanes: 0=class focal, 1=box L1, 2=box GIoU, 3=mask focal, 4=dice.
# ---------------------------------------------------------------------------
def _criterion_kernel(logits_ref, tclass_ref, sbox_ref, tbox_ref, kt_ref,
                      pmask_ref, gmask_ref, out_ref, sacc_ref,
                      *, alpha, gamma, inv_cls, inv_pix):
    step = pl.program_id(0)
    last = pl.num_programs(0) - 1
    lane = jax.lax.broadcasted_iota(jnp.int32, (1, 128), 1)

    # ---- step 0 only: classification focal + box L1/GIoU (tiny resident blocks) ----
    @pl.when(step == 0)
    def _():
        x = logits_ref[...].astype(jnp.float32)                    # [C, B*Q]  (queries on lanes)
        tc = tclass_ref[...]                                       # [1, B*Q]  int32
        c, r = x.shape
        tpos = jax.lax.broadcasted_iota(jnp.int32, (c, r), 0) == tc    # in-kernel one-hot
        loss_ce, _ = _binary_focal(x, tpos, alpha, gamma)
        ce = jnp.sum(loss_ce) * inv_cls                             # == loss.mean(class).sum()

        s = sbox_ref[...].astype(jnp.float32)                       # [4, N] cxcywh, coords on sublanes
        t = tbox_ref[...].astype(jnp.float32)
        l1 = jnp.sum(jnp.abs(s - t))

        def to_xyxy(b):
            cx, cy, w, h = b[0:1], b[1:2], b[2:3], b[3:4]
            return cx - 0.5 * w, cy - 0.5 * h, cx + 0.5 * w, cy + 0.5 * h

        sx0, sy0, sx1, sy1 = to_xyxy(s)
        tx0, ty0, tx1, ty1 = to_xyxy(t)
        area_s = (sx1 - sx0) * (sy1 - sy0)
        area_t = (tx1 - tx0) * (ty1 - ty0)
        iw = jnp.maximum(jnp.minimum(sx1, tx1) - jnp.maximum(sx0, tx0), 0.0)
        ih = jnp.maximum(jnp.minimum(sy1, ty1) - jnp.maximum(sy0, ty0), 0.0)
        inter = iw * ih
        union = area_s + area_t - inter
        iou = inter / jnp.maximum(union, 1e-7)                      # eps-guarded
        ew = jnp.maximum(sx1, tx1) - jnp.minimum(sx0, tx0)
        eh = jnp.maximum(sy1, ty1) - jnp.minimum(sy0, ty0)
        enc = ew * eh
        giou = iou - (enc - union) / jnp.maximum(enc, 1e-7)
        giou_sum = jnp.sum(1.0 - giou)

        sacc_ref[...] = (jnp.where(lane == 0, ce, 0.0)
                         + jnp.where(lane == 1, l1, 0.0)
                         + jnp.where(lane == 2, giou_sum, 0.0))

    # ---- every step: mask focal + dice on one lane-dense row tile ----
    m = pmask_ref[...].astype(jnp.float32)                          # [tn, MH*MW]  (bf16 stream)
    g = gmask_ref[...].astype(jnp.float32)                          # [tn, GH*GW]  (bf16 binary)
    # fused bilinear upsample: one MXU matmul against the Kronecker matrix K^T
    up = jnp.dot(m, kt_ref[...], preferred_element_type=jnp.float32)    # [tn, GH*GW]
    tpos = g > 0.5
    loss_m, p = _binary_focal(up, tpos, alpha, gamma)
    mf_part = jnp.sum(loss_m)
    num = 2.0 * jnp.sum(p * g, axis=-1, keepdims=True)              # [tn, 1]
    den = jnp.sum(p + g, axis=-1, keepdims=True)                    # single extra reduce
    dice_part = jnp.sum(1.0 - (num + 1.0) / (den + 1.0))
    sacc_ref[...] += (jnp.where(lane == 3, mf_part, 0.0)
                      + jnp.where(lane == 4, dice_part, 0.0))

    @pl.when(step == last)
    def _():
        out_ref[...] = sacc_ref[...] * jnp.where(lane == 3, inv_pix, 1.0)


def _criterion_losses(logits_t, tclass, sbox_t, tbox_t, kt, pmask2d, gmask2d,
                      *, alpha, gamma, row_tile, vmem_limit):
    C, R = logits_t.shape
    Nb = sbox_t.shape[1]
    Np, Qpix = pmask2d.shape
    _, Ppix = gmask2d.shape
    grid = (Np // row_tile,)
    kern = functools.partial(_criterion_kernel, alpha=alpha, gamma=gamma,
                             inv_cls=1.0 / C, inv_pix=1.0 / Ppix)
    out = pl.pallas_call(
        kern,
        out_shape=jax.ShapeDtypeStruct((1, 128), jnp.float32),
        grid_spec=pltpu.PrefetchScalarGridSpec(
            num_scalar_prefetch=0,
            grid=grid,
            in_specs=[
                pl.BlockSpec((C, R), lambda i: (0, 0)),              # logits^T (resident)
                pl.BlockSpec((1, R), lambda i: (0, 0)),              # int32 target class ids
                pl.BlockSpec((4, Nb), lambda i: (0, 0)),             # matched src boxes [4, N]
                pl.BlockSpec((4, Nb), lambda i: (0, 0)),             # matched tgt boxes [4, N]
                pl.BlockSpec((Qpix, Ppix), lambda i: (0, 0)),        # Kronecker interp matrix K^T
                pl.BlockSpec((row_tile, Qpix), lambda i: (i, 0)),    # pred masks (bf16, lane-dense)
                pl.BlockSpec((row_tile, Ppix), lambda i: (i, 0)),    # GT masks  (bf16, lane-dense)
            ],
            out_specs=pl.BlockSpec((1, 128), lambda i: (0, 0)),      # one lane-dense loss block
            scratch_shapes=[pltpu.VMEM((1, 128), jnp.float32)],      # scalar accumulator vreg
        ),
        compiler_params=pltpu.CompilerParams(
            dimension_semantics=("arbitrary",),   # accumulation over row tiles
            vmem_limit_bytes=vmem_limit,
        ),
    )(logits_t, tclass, sbox_t, tbox_t, kt, pmask2d, gmask2d)
    return out[0, 0], out[0, 1], out[0, 2], out[0, 3], out[0, 4]


# ---------------------------------------------------------------------------
# Per-generation tiling heuristics.
# ---------------------------------------------------------------------------
def _vmem_limit_bytes():
    try:
        kind = jax.devices()[0].device_kind.lower()
    except Exception:  # pragma: no cover
        kind = ""
    if "v5" in kind or "v6" in kind:
        return 100 * 1024 * 1024          # 128 MiB physical on v5e/v6e
    return 48 * 1024 * 1024               # v7x (64 MiB physical) / unknown: conservative


def _pick_row_tile(n_rows, q_pix, p_pix, vmem_budget):
    """Largest MXU-friendly row tile whose double-buffered streams + f32
    temporaries stay well inside the VMEM budget."""
    n_rows = max(int(n_rows), 1)
    bytes_per_row = 2 * 2 * (q_pix + p_pix) + 4 * 4 * p_pix   # bf16 dbl-buf in + f32 temps
    tile = max(16, (vmem_budget // 2) // max(bytes_per_row, 1))
    if tile >= 128:
        tile = min(512, (tile // 128) * 128)
    else:
        tile = max(16, (tile // 16) * 16)
    n_pad16 = -(-n_rows // 16) * 16
    if n_pad16 <= tile:
        return n_pad16                     # single grid step, tile == (padded) row count
    return tile


# ---------------------------------------------------------------------------
# Host-built bilinear interpolation matrices (F.interpolate, align_corners=False)
# ---------------------------------------------------------------------------
def _bilinear_matrix(out_size, in_size):
    A = np.zeros((out_size, in_size), np.float32)
    if in_size == 1:
        A[:, 0] = 1.0
        return A
    scale = in_size / out_size
    for i in range(out_size):
        src = max((i + 0.5) * scale - 0.5, 0.0)
        i0 = min(int(np.floor(src)), in_size - 1)
        i1 = min(i0 + 1, in_size - 1)
        w1 = src - i0
        A[i, i0] += 1.0 - w1
        A[i, i1] += w1
    return A


def _kron_interp_matrix_t(GH, GW, MH, MW):
    """K^T with K = kron(Ah, Aw): up_flat = m_flat @ K^T."""
    ah = _bilinear_matrix(GH, MH)
    aw = _bilinear_matrix(GW, MW)
    return np.kron(ah, aw).T.astype(np.float32)          # [MH*MW, GH*GW]


# ---------------------------------------------------------------------------
# Device-side matcher (no host sync) + criterion forward
# ---------------------------------------------------------------------------
def greedy_matcher(pred_boxes, tgt_boxes):
    """Device-side greedy L1 matcher, [B,Q,4] x [B,T,4] -> [B,T] query indices.
    TODO(synk): Hungarian assignment (scipy.linear_sum_assignment) has no clean
    Pallas/JAX equivalent; replaced by a deterministic greedy matcher kept on
    device so the loss kernel dispatch is not blocked by a host round-trip."""
    cost = jnp.sum(jnp.abs(pred_boxes[:, :, None, :] - tgt_boxes[:, None, :, :]), axis=-1)

    def per_image(c):
        q_n, t_n = c.shape

        def body(ti, carry):
            used, src = carry
            col = jnp.where(used, jnp.inf,
                            jax.lax.dynamic_index_in_dim(c, ti, axis=1, keepdims=False))
            qi = jnp.argmin(col).astype(jnp.int32)
            return used.at[qi].set(True), src.at[ti].set(qi)

        init = (jnp.zeros((q_n,), jnp.bool_), jnp.zeros((t_n,), jnp.int32))
        _, src = jax.lax.fori_loop(0, t_n, body, init)
        return src

    return jax.vmap(per_image)(cost)


def mask_det_set_criterion_forward(outputs, targets, *, num_classes, focal_alpha,
                                   losses, task_size=1):
    """JAX/Pallas re-implementation of MaskDetSetCriterion.forward
       (predict3d=False, xyxy=False, no aux_outputs / enc_outputs)."""
    pred_boxes = outputs["pred_points"]           # predict3d=False, xyxy=False
    pred_logits = outputs["pred_logits"]
    pred_masks = outputs["pred_masks"]
    B, Q, C = pred_logits.shape

    tgt_boxes = jnp.stack([jnp.asarray(t["boxes"], jnp.float32) for t in targets])   # [B,T,4]
    tgt_labels = jnp.stack([jnp.asarray(t["labels"], jnp.int32) for t in targets])   # [B,T]
    T = int(tgt_boxes.shape[1])
    # TODO(synk): variable-length target lists per image would need per-image padding.

    src_idx = greedy_matcher(pred_boxes, tgt_boxes)                                  # [B,T]
    batch_ar = jnp.arange(B)[:, None]

    num_boxes = float(sum(int(t["labels"].shape[0]) for t in targets))
    # TODO(synk): dist.all_reduce(num_boxes) skipped — single-device run.
    num_boxes = max(num_boxes / task_size, 1.0)

    # ---- matched gathers / scatter (device-side, no host round-trip) ----
    N = B * T
    src_boxes = pred_boxes[batch_ar, src_idx].reshape(N, 4).astype(jnp.float32)
    target_boxes = tgt_boxes.reshape(N, 4)
    sbox_t = src_boxes.T                                                            # [4, N]
    tbox_t = target_boxes.T                                                         # [4, N]

    target_classes = jnp.full((B, Q), num_classes, jnp.int32)
    target_classes = target_classes.at[batch_ar, src_idx].set(tgt_labels)
    tclass = target_classes.reshape(1, B * Q)
    logits_t = pred_logits.reshape(B * Q, C).T                                      # [C, B*Q] lane-dense
    # TODO(synk): box_ioa-based 'ignore' filtering not exercised (empty ignore set),
    # so valid_mask is all-True, as in the reference with empty `ignore`.

    if "masks" in losses:
        tgt_masks = jnp.stack([jnp.asarray(t["masks"]) for t in targets])           # [B,T,GH,GW]
        GH, GW = int(tgt_masks.shape[-2]), int(tgt_masks.shape[-1])
        MH, MW = int(pred_masks.shape[-2]), int(pred_masks.shape[-1])
        Qpix, Ppix = MH * MW, GH * GW
        src_m = pred_masks[batch_ar, src_idx].reshape(N, Qpix).astype(jnp.bfloat16)
        gt_m = tgt_masks.reshape(N, Ppix).astype(jnp.bfloat16)                      # binary -> exact
        kt = jnp.asarray(_kron_interp_matrix_t(GH, GW, MH, MW))                     # [Qpix, Ppix] f32
    else:
        Qpix = Ppix = 1
        src_m = jnp.full((N, 1), -40.0, jnp.bfloat16)
        gt_m = jnp.zeros((N, 1), jnp.bfloat16)
        kt = jnp.ones((1, 1), jnp.float32)
        GH = GW = 1

    # ---- pad matched-pair axis; padded rows (logit -40 / GT 0) contribute ~0 ----
    vmem_limit = _vmem_limit_bytes()
    row_tile = _pick_row_tile(N, Qpix, Ppix, vmem_limit)
    Np = max(-(-N // row_tile), 1) * row_tile
    padn = Np - N
    src_m = jnp.pad(src_m, ((0, padn), (0, 0)), constant_values=-40.0)
    gt_m = jnp.pad(gt_m, ((0, padn), (0, 0)))

    ce, l1, giou, mfocal, dice = _criterion_losses(
        logits_t, tclass, sbox_t, tbox_t, kt, src_m, gt_m,
        alpha=focal_alpha, gamma=2, row_tile=row_tile, vmem_limit=vmem_limit)

    out = {}
    if "labels" in losses:
        out["loss__ce"] = ce / num_boxes
        out["valid_ratio"] = jnp.float32(1.0)
        # TODO(synk): reference accuracy() is shape-inconsistent for one-hot labels (C>1);
        # approximated as top-1 "argmax hits the matched class" rate.
        pred_top1 = jnp.argmax(pred_logits.reshape(B * Q, C), axis=-1)
        tcf = target_classes.reshape(-1)
        hit = ((pred_top1 == tcf) & (tcf != num_classes)).astype(jnp.float32)
        out["top1"] = 100.0 * jnp.mean(hit)
    if "cardinality" in losses:
        tgt_lengths = jnp.asarray([int(t["labels"].shape[0]) for t in targets], jnp.float32)
        card_pred = jnp.sum(
            (jnp.argmax(pred_logits, axis=-1) != (C - 1)).astype(jnp.float32), axis=1)
        out["cardinality_error"] = jnp.mean(jnp.abs(card_pred - tgt_lengths))
    if "boxes" in losses:
        out["loss__bbox"] = l1 / num_boxes
        out["loss__giou"] = giou / num_boxes
    if "masks" in losses:
        out["loss_mask"] = mfocal / num_boxes
        out["loss_dice"] = dice / num_boxes
    return out


# ---------------------------------------------------------------------------
# main
# ---------------------------------------------------------------------------
if __name__ == "__main__":
    B, Q, C = 2, 16, 4          # batch, queries, num_classes
    T = 8                       # targets per image  (=> 16 matched pairs)
    MH, MW = 8, 8               # predicted mask resolution
    GH, GW = 16, 16             # ground-truth mask resolution

    key = jax.random.PRNGKey(0)
    k1, k2, k3, k4, k5, k6, k7 = jax.random.split(key, 7)

    pred_logits = jax.random.normal(k1, (B, Q, C), dtype=jnp.float32)
    pred_cxcy = jax.random.uniform(k2, (B, Q, 2), minval=0.2, maxval=0.8)
    pred_wh = jax.random.uniform(k3, (B, Q, 2), minval=0.1, maxval=0.4)
    pred_points = jnp.concatenate([pred_cxcy, pred_wh], axis=-1)
    pred_masks = jax.random.normal(k4, (B, Q, MH, MW), dtype=jnp.float32)

    tgt_cxcy = jax.random.uniform(k5, (B, T, 2), minval=0.25, maxval=0.75)
    tgt_wh = jax.random.uniform(k6, (B, T, 2), minval=0.15, maxval=0.35)
    tgt_boxes = jnp.concatenate([tgt_cxcy, tgt_wh], axis=-1)           # cxcywh
    tgt_labels = jax.random.randint(k7, (B, T), 0, C)

    # binary GT masks derived from the GT boxes
    ys = (jnp.arange(GH, dtype=jnp.float32) + 0.5) / GH
    xs = (jnp.arange(GW, dtype=jnp.float32) + 0.5) / GW
    cx = tgt_boxes[..., 0][..., None, None]
    cy = tgt_boxes[..., 1][..., None, None]
    w = tgt_boxes[..., 2][..., None, None]
    h = tgt_boxes[..., 3][..., None, None]
    in_x = (xs[None, None, None, :] >= cx - 0.5 * w) & (xs[None, None, None, :] <= cx + 0.5 * w)
    in_y = (ys[None, None, :, None] >= cy - 0.5 * h) & (ys[None, None, :, None] <= cy + 0.5 * h)
    tgt_masks = (in_x & in_y).astype(jnp.float32)                      # [B, T, GH, GW]

    outputs = {
        "pred_logits": pred_logits,
        "pred_points": pred_points,
        "pred_masks": pred_masks,
    }
    targets = [
        {"boxes": tgt_boxes[b], "labels": tgt_labels[b], "masks": tgt_masks[b],
         "ignore": jnp.zeros((0, 4), jnp.float32)}
        for b in range(B)
    ]

    losses = mask_det_set_criterion_forward(
        outputs, targets,
        num_classes=C, focal_alpha=0.25,
        losses=["labels", "cardinality", "boxes", "masks"],
        task_size=1,
    )

    losses = {k: jax.block_until_ready(v) for k, v in losses.items()}
    assert all(np.isfinite(np.asarray(v)).all() for v in losses.values())
    print("KERNEL_OK")
</pallas_src>

<mosaic_0001>
module attributes {stable_mosaic.version = 11 : i64} {
  func.func @_criterion_kernel(%arg0: i32, %arg1: memref<4x32xf32, #tpu.memory_space<vmem>>, %arg2: memref<1x32xi32, #tpu.memory_space<vmem>>, %arg3: memref<4x16xf32, #tpu.memory_space<vmem>>, %arg4: memref<4x16xf32, #tpu.memory_space<vmem>>, %arg5: memref<64x256xf32, #tpu.memory_space<vmem>>, %arg6: memref<16x64xbf16, #tpu.memory_space<vmem>>, %arg7: memref<16x256xbf16, #tpu.memory_space<vmem>>, %arg8: memref<1x128xf32, #tpu.memory_space<vmem>>, %arg9: memref<1x128xf32, #tpu.memory_space<vmem>>) attributes {dimension_semantics = [#tpu.dimension_semantics<arbitrary>], iteration_bounds = array<i64: 1>, scalar_prefetch = 0 : i64, scratch_operands = 1 : i64, tpu.core_type = #tpu.core_type<tc>, window_params = [{pipeline_mode = #tpu.pipeline_mode<synchronous>, transform_indices = @transform_0, window_bounds = array<i64: 4, 32>}, {pipeline_mode = #tpu.pipeline_mode<synchronous>, transform_indices = @transform_1, window_bounds = array<i64: 1, 32>}, {pipeline_mode = #tpu.pipeline_mode<synchronous>, transform_indices = @transform_2, window_bounds = array<i64: 4, 16>}, {pipeline_mode = #tpu.pipeline_mode<synchronous>, transform_indices = @transform_3, window_bounds = array<i64: 4, 16>}, {pipeline_mode = #tpu.pipeline_mode<synchronous>, transform_indices = @transform_4, window_bounds = array<i64: 64, 256>}, {transform_indices = @transform_5, window_bounds = array<i64: 16, 64>}, {transform_indices = @transform_6, window_bounds = array<i64: 16, 256>}, {pipeline_mode = #tpu.pipeline_mode<synchronous>, transform_indices = @transform_7, window_bounds = array<i64: 1, 128>}]} {
    %0 = tpu.iota {dimensions = array<i32: 1>} : vector<1x128xi32>
    %c0_i32 = arith.constant 0 : i32
    %1 = arith.cmpi eq, %arg0, %c0_i32 : i32
    %2 = arith.extui %1 : i1 to i32
    %c0_i32_0 = arith.constant 0 : i32
    %3 = arith.cmpi ne, %2, %c0_i32_0 : i32
    scf.if %3 {
      %c0_32 = arith.constant 0 : index
      %c0_33 = arith.constant 0 : index
      %79 = vector.load %arg1[%c0_32, %c0_33] : memref<4x32xf32, #tpu.memory_space<vmem>>, vector<4x32xf32>
      %c0_34 = arith.constant 0 : index
      %c0_35 = arith.constant 0 : index
      %80 = vector.load %arg2[%c0_34, %c0_35] : memref<1x32xi32, #tpu.memory_space<vmem>>, vector<1x32xi32>
      %81 = tpu.iota {dimensions = array<i32: 0>} : vector<4x32xi32>
      %82 = vector.broadcast %80 : vector<1x32xi32> to vector<4x32xi32>
      %83 = arith.cmpi eq, %81, %82 : vector<4x32xi32>
      %84 = math.absf %79 : vector<4x32xf32>
      %cst_36 = arith.constant 0.000000e+00 : f32
      %85 = vector.broadcast %cst_36 : f32 to vector<4x32xf32>
      %86 = arith.subf %85, %84 : vector<4x32xf32>
      %87 = math.exp %86 : vector<4x32xf32>
      %cst_37 = arith.constant 0.000000e+00 : f32
      %88 = vector.broadcast %cst_37 : f32 to vector<4x32xf32>
      %89 = arith.cmpf oge, %79, %88 : vector<4x32xf32>
      %cst_38 = arith.constant 1.000000e+00 : f32
      %90 = vector.broadcast %cst_38 : f32 to vector<4x32xf32>
      %91 = arith.select %89, %90, %87 : vector<4x32xi1>, vector<4x32xf32>
      %cst_39 = arith.constant 1.000000e+00 : f32
      %92 = vector.broadcast %cst_39 : f32 to vector<4x32xf32>
      %93 = arith.addf %92, %87 : vector<4x32xf32>
      %94 = arith.divf %91, %93 : vector<4x32xf32>
      %cst_40 = arith.constant 0.000000e+00 : f32
      %95 = vector.broadcast %cst_40 : f32 to vector<4x32xf32>
      %96 = arith.maximumf %79, %95 : vector<4x32xf32>
      %cst_41 = arith.constant 0.000000e+00 : f32
      %97 = vector.broadcast %cst_41 : f32 to vector<4x32xf32>
      %98 = arith.select %83, %79, %97 : vector<4x32xi1>, vector<4x32xf32>
      %99 = arith.subf %96, %98 : vector<4x32xf32>
      %100 = math.log1p %87 : vector<4x32xf32>
      %101 = arith.addf %99, %100 : vector<4x32xf32>
      %cst_42 = arith.constant 1.000000e+00 : f32
      %102 = vector.broadcast %cst_42 : f32 to vector<4x32xf32>
      %103 = arith.subf %102, %94 : vector<4x32xf32>
      %104 = arith.select %83, %103, %94 : vector<4x32xi1>, vector<4x32xf32>
      %105 = arith.mulf %104, %104 : vector<4x32xf32>
      %106 = arith.mulf %101, %105 : vector<4x32xf32>
      %cst_43 = arith.constant 2.500000e-01 : f32
      %cst_44 = arith.constant 7.500000e-01 : f32
      %107 = vector.broadcast %cst_43 : f32 to vector<4x32xf32>
      %108 = vector.broadcast %cst_44 : f32 to vector<4x32xf32>
      %109 = arith.select %83, %107, %108 : vector<4x32xi1>, vector<4x32xf32>
      %110 = arith.mulf %109, %106 : vector<4x32xf32>
      %111 = vector.shape_cast %110 : vector<4x32xf32> to vector<1x4x32xf32>
      %cst_45 = arith.constant dense<0.000000e+00> : vector<1xf32>
      %112 = vector.multi_reduction <add>, %111, %cst_45 [1, 2] : vector<1x4x32xf32> to vector<1xf32>
      %113 = vector.shape_cast %112 : vector<1xf32> to vector<1x1x1xf32>
      %114 = vector.extract %113[0, 0, 0] : f32 from vector<1x1x1xf32>
      %cst_46 = arith.constant 2.500000e-01 : f32
      %115 = arith.mulf %114, %cst_46 : f32
      %c0_47 = arith.constant 0 : index
      %c0_48 = arith.constant 0 : index
      %116 = vector.load %arg3[%c0_47, %c0_48] : memref<4x16xf32, #tpu.memory_space<vmem>>, vector<4x16xf32>
      %c0_49 = arith.constant 0 : index
      %c0_50 = arith.constant 0 : index
      %117 = vector.load %arg4[%c0_49, %c0_50] : memref<4x16xf32, #tpu.memory_space<vmem>>, vector<4x16xf32>
      %118 = arith.subf %116, %117 : vector<4x16xf32>
      %119 = math.absf %118 : vector<4x16xf32>
      %120 = vector.shape_cast %119 : vector<4x16xf32> to vector<1x4x16xf32>
      %cst_51 = arith.constant dense<0.000000e+00> : vector<1xf32>
      %121 = vector.multi_reduction <add>, %120, %cst_51 [1, 2] : vector<1x4x16xf32> to vector<1xf32>
      %122 = vector.shape_cast %121 : vector<1xf32> to vector<1x1x1xf32>
      %123 = vector.extract %122[0, 0, 0] : f32 from vector<1x1x1xf32>
      %124 = vector.extract_strided_slice %116 {offsets = [0, 0], sizes = [1, 16], strides = [1, 1]} : vector<4x16xf32> to vector<1x16xf32>
      %125 = vector.extract_strided_slice %116 {offsets = [1, 0], sizes = [1, 16], strides = [1, 1]} : vector<4x16xf32> to vector<1x16xf32>
      %126 = vector.extract_strided_slice %116 {offsets = [2, 0], sizes = [1, 16], strides = [1, 1]} : vector<4x16xf32> to vector<1x16xf32>
      %127 = vector.extract_strided_slice %116 {offsets = [3, 0], sizes = [1, 16], strides = [1, 1]} : vector<4x16xf32> to vector<1x16xf32>
      %cst_52 = arith.constant 5.000000e-01 : f32
      %128 = vector.broadcast %cst_52 : f32 to vector<1x16xf32>
      %129 = arith.mulf %128, %126 : vector<1x16xf32>
      %130 = arith.subf %124, %129 : vector<1x16xf32>
      %cst_53 = arith.constant 5.000000e-01 : f32
      %131 = vector.broadcast %cst_53 : f32 to vector<1x16xf32>
      %132 = arith.mulf %131, %127 : vector<1x16xf32>
      %133 = arith.subf %125, %132 : vector<1x16xf32>
      %cst_54 = arith.constant 5.000000e-01 : f32
      %134 = vector.broadcast %cst_54 : f32 to vector<1x16xf32>
      %135 = arith.mulf %134, %126 : vector<1x16xf32>
      %136 = arith.addf %124, %135 : vector<1x16xf32>
      %cst_55 = arith.constant 5.000000e-01 : f32
      %137 = vector.broadcast %cst_55 : f32 to vector<1x16xf32>
      %138 = arith.mulf %137, %127 : vector<1x16xf32>
      %139 = arith.addf %125, %138 : vector<1x16xf32>
      %140 = vector.extract_strided_slice %117 {offsets = [0, 0], sizes = [1, 16], strides = [1, 1]} : vector<4x16xf32> to vector<1x16xf32>
      %141 = vector.extract_strided_slice %117 {offsets = [1, 0], sizes = [1, 16], strides = [1, 1]} : vector<4x16xf32> to vector<1x16xf32>
      %142 = vector.extract_strided_slice %117 {offsets = [2, 0], sizes = [1, 16], strides = [1, 1]} : vector<4x16xf32> to vector<1x16xf32>
      %143 = vector.extract_strided_slice %117 {offsets = [3, 0], sizes = [1, 16], strides = [1, 1]} : vector<4x16xf32> to vector<1x16xf32>
      %cst_56 = arith.constant 5.000000e-01 : f32
      %144 = vector.broadcast %cst_56 : f32 to vector<1x16xf32>
      %145 = arith.mulf %144, %142 : vector<1x16xf32>
      %146 = arith.subf %140, %145 : vector<1x16xf32>
      %cst_57 = arith.constant 5.000000e-01 : f32
      %147 = vector.broadcast %cst_57 : f32 to vector<1x16xf32>
      %148 = arith.mulf %147, %143 : vector<1x16xf32>
      %149 = arith.subf %141, %148 : vector<1x16xf32>
      %cst_58 = arith.constant 5.000000e-01 : f32
      %150 = vector.broadcast %cst_58 : f32 to vector<1x16xf32>
      %151 = arith.mulf %150, %142 : vector<1x16xf32>
      %152 = arith.addf %140, %151 : vector<1x16xf32>
      %cst_59 = arith.constant 5.000000e-01 : f32
      %153 = vector.broadcast %cst_59 : f32 to vector<1x16xf32>
      %154 = arith.mulf %153, %143 : vector<1x16xf32>
      %155 = arith.addf %141, %154 : vector<1x16xf32>
      %156 = arith.subf %136, %130 : vector<1x16xf32>
      %157 = arith.subf %139, %133 : vector<1x16xf32>
      %158 = arith.mulf %156, %157 : vector<1x16xf32>
      %159 = arith.subf %152, %146 : vector<1x16xf32>
      %160 = arith.subf %155, %149 : vector<1x16xf32>
      %161 = arith.mulf %159, %160 : vector<1x16xf32>
      %162 = arith.minimumf %136, %152 : vector<1x16xf32>
      %163 = arith.maximumf %130, %146 : vector<1x16xf32>
      %164 = arith.subf %162, %163 : vector<1x16xf32>
      %cst_60 = arith.constant 0.000000e+00 : f32
      %165 = vector.broadcast %cst_60 : f32 to vector<1x16xf32>
      %166 = arith.maximumf %164, %165 : vector<1x16xf32>
      %167 = arith.minimumf %139, %155 : vector<1x16xf32>
      %168 = arith.maximumf %133, %149 : vector<1x16xf32>
      %169 = arith.subf %167, %168 : vector<1x16xf32>
      %cst_61 = arith.constant 0.000000e+00 : f32
      %170 = vector.broadcast %cst_61 : f32 to vector<1x16xf32>
      %171 = arith.maximumf %169, %170 : vector<1x16xf32>
      %172 = arith.mulf %166, %171 : vector<1x16xf32>
      %173 = arith.addf %158, %161 : vector<1x16xf32>
      %174 = arith.subf %173, %172 : vector<1x16xf32>
      %cst_62 = arith.constant 1.000000e-07 : f32
      %175 = vector.broadcast %cst_62 : f32 to vector<1x16xf32>
      %176 = arith.maximumf %174, %175 : vector<1x16xf32>
      %177 = arith.divf %172, %176 : vector<1x16xf32>
      %178 = arith.maximumf %136, %152 : vector<1x16xf32>
      %179 = arith.minimumf %130, %146 : vector<1x16xf32>
      %180 = arith.subf %178, %179 : vector<1x16xf32>
      %181 = arith.maximumf %139, %155 : vector<1x16xf32>
      %182 = arith.minimumf %133, %149 : vector<1x16xf32>
      %183 = arith.subf %181, %182 : vector<1x16xf32>
      %184 = arith.mulf %180, %183 : vector<1x16xf32>
      %185 = arith.subf %184, %174 : vector<1x16xf32>
      %cst_63 = arith.constant 1.000000e-07 : f32
      %186 = vector.broadcast %cst_63 : f32 to vector<1x16xf32>
      %187 = arith.maximumf %184, %186 : vector<1x16xf32>
      %188 = arith.divf %185, %187 : vector<1x16xf32>
      %189 = arith.subf %177, %188 : vector<1x16xf32>
      %cst_64 = arith.constant 1.000000e+00 : f32
      %190 = vector.broadcast %cst_64 : f32 to vector<1x16xf32>
      %191 = arith.subf %190, %189 : vector<1x16xf32>
      %192 = vector.shape_cast %191 : vector<1x16xf32> to vector<1x1x16xf32>
      %cst_65 = arith.constant dense<0.000000e+00> : vector<1xf32>
      %193 = vector.multi_reduction <add>, %192, %cst_65 [1, 2] : vector<1x1x16xf32> to vector<1xf32>
      %194 = vector.shape_cast %193 : vector<1xf32> to vector<1x1x1xf32>
      %195 = vector.extract %194[0, 0, 0] : f32 from vector<1x1x1xf32>
      %c0_i32_66 = arith.constant 0 : i32
      %196 = vector.broadcast %c0_i32_66 : i32 to vector<1x128xi32>
      %197 = arith.cmpi eq, %0, %196 : vector<1x128xi32>
      %cst_67 = arith.constant 0.000000e+00 : f32
      %198 = vector.broadcast %115 : f32 to vector<1x128xf32>
      %199 = vector.broadcast %cst_67 : f32 to vector<1x128xf32>
      %200 = arith.select %197, %198, %199 : vector<1x128xi1>, vector<1x128xf32>
      %c1_i32 = arith.constant 1 : i32
      %201 = vector.broadcast %c1_i32 : i32 to vector<1x128xi32>
      %202 = arith.cmpi eq, %0, %201 : vector<1x128xi32>
      %cst_68 = arith.constant 0.000000e+00 : f32
      %203 = vector.broadcast %123 : f32 to vector<1x128xf32>
      %204 = vector.broadcast %cst_68 : f32 to vector<1x128xf32>
      %205 = arith.select %202, %203, %204 : vector<1x128xi1>, vector<1x128xf32>
      %206 = arith.addf %200, %205 : vector<1x128xf32>
      %c2_i32 = arith.constant 2 : i32
      %207 = vector.broadcast %c2_i32 : i32 to vector<1x128xi32>
      %208 = arith.cmpi eq, %0, %207 : vector<1x128xi32>
      %cst_69 = arith.constant 0.000000e+00 : f32
      %209 = vector.broadcast %195 : f32 to vector<1x128xf32>
      %210 = vector.broadcast %cst_69 : f32 to vector<1x128xf32>
      %211 = arith.select %208, %209, %210 : vector<1x128xi1>, vector<1x128xf32>
      %212 = arith.addf %206, %211 : vector<1x128xf32>
      %c0_70 = arith.constant 0 : index
      %c0_71 = arith.constant 0 : index
      %213 = vector.load %arg9[%c0_70, %c0_71] : memref<1x128xf32, #tpu.memory_space<vmem>>, vector<1x128xf32>
      tpu.vector_store %arg9[%c0_70, %c0_71], %212 {strides = array<i32>} : memref<1x128xf32, #tpu.memory_space<vmem>>, vector<1x128xf32>,
    } else {
    }
    %c0 = arith.constant 0 : index
    %c0_1 = arith.constant 0 : index
    %4 = vector.load %arg6[%c0, %c0_1] : memref<16x64xbf16, #tpu.memory_space<vmem>>, vector<16x64xbf16>
    %5 = arith.extf %4 : vector<16x64xbf16> to vector<16x64xf32>
    %c0_2 = arith.constant 0 : index
    %c0_3 = arith.constant 0 : index
    %6 = vector.load %arg7[%c0_2, %c0_3] : memref<16x256xbf16, #tpu.memory_space<vmem>>, vector<16x256xbf16>
    %7 = arith.extf %6 : vector<16x256xbf16> to vector<16x256xf32>
    %c0_4 = arith.constant 0 : index
    %c0_5 = arith.constant 0 : index
    %8 = vector.load %arg5[%c0_4, %c0_5] : memref<64x256xf32, #tpu.memory_space<vmem>>, vector<64x256xf32>
    %cst = arith.constant dense<0.000000e+00> : vector<16x256xf32>
    %9 = tpu.matmul %5, %8, %cst {dimension_numbers = #tpu.dot_dimension_numbers<[1], [0], [0], [1], [0, 0, 1, 1], [], []>} : vector<16x64xf32>, vector<64x256xf32>, vector<16x256xf32> -> vector<16x256xf32>
    %cst_6 = arith.constant 5.000000e-01 : f32
    %10 = vector.broadcast %cst_6 : f32 to vector<16x256xf32>
    %11 = arith.cmpf ogt, %7, %10 : vector<16x256xf32>
    %12 = math.absf %9 : vector<16x256xf32>
    %cst_7 = arith.constant 0.000000e+00 : f32
    %13 = vector.broadcast %cst_7 : f32 to vector<16x256xf32>
    %14 = arith.subf %13, %12 : vector<16x256xf32>
    %15 = math.exp %14 : vector<16x256xf32>
    %cst_8 = arith.constant 0.000000e+00 : f32
    %16 = vector.broadcast %cst_8 : f32 to vector<16x256xf32>
    %17 = arith.cmpf oge, %9, %16 : vector<16x256xf32>
    %cst_9 = arith.constant 1.000000e+00 : f32
    %18 = vector.broadcast %cst_9 : f32 to vector<16x256xf32>
    %19 = arith.select %17, %18, %15 : vector<16x256xi1>, vector<16x256xf32>
    %cst_10 = arith.constant 1.000000e+00 : f32
    %20 = vector.broadcast %cst_10 : f32 to vector<16x256xf32>
    %21 = arith.addf %20, %15 : vector<16x256xf32>
    %22 = arith.divf %19, %21 : vector<16x256xf32>
    %cst_11 = arith.constant 0.000000e+00 : f32
    %23 = vector.broadcast %cst_11 : f32 to vector<16x256xf32>
    %24 = arith.maximumf %9, %23 : vector<16x256xf32>
    %cst_12 = arith.constant 0.000000e+00 : f32
    %25 = vector.broadcast %cst_12 : f32 to vector<16x256xf32>
    %26 = arith.select %11, %9, %25 : vector<16x256xi1>, vector<16x256xf32>
    %27 = arith.subf %24, %26 : vector<16x256xf32>
    %28 = math.log1p %15 : vector<16x256xf32>
    %29 = arith.addf %27, %28 : vector<16x256xf32>
    %cst_13 = arith.constant 1.000000e+00 : f32
    %30 = vector.broadcast %cst_13 : f32 to vector<16x256xf32>
    %31 = arith.subf %30, %22 : vector<16x256xf32>
    %32 = arith.select %11, %31, %22 : vector<16x256xi1>, vector<16x256xf32>
    %33 = arith.mulf %32, %32 : vector<16x256xf32>
    %34 = arith.mulf %29, %33 : vector<16x256xf32>
    %cst_14 = arith.constant 2.500000e-01 : f32
    %cst_15 = arith.constant 7.500000e-01 : f32
    %35 = vector.broadcast %cst_14 : f32 to vector<16x256xf32>
    %36 = vector.broadcast %cst_15 : f32 to vector<16x256xf32>
    %37 = arith.select %11, %35, %36 : vector<16x256xi1>, vector<16x256xf32>
    %38 = arith.mulf %37, %34 : vector<16x256xf32>
    %39 = vector.shape_cast %38 : vector<16x256xf32> to vector<1x16x256xf32>
    %cst_16 = arith.constant dense<0.000000e+00> : vector<1xf32>
    %40 = vector.multi_reduction <add>, %39, %cst_16 [1, 2] : vector<1x16x256xf32> to vector<1xf32>
    %41 = vector.shape_cast %40 : vector<1xf32> to vector<1x1x1xf32>
    %42 = vector.extract %41[0, 0, 0] : f32 from vector<1x1x1xf32>
    %43 = arith.mulf %22, %7 : vector<16x256xf32>
    %cst_17 = arith.constant dense<0.000000e+00> : vector<16xf32>
    %44 = vector.multi_reduction <add>, %43, %cst_17 [1] : vector<16x256xf32> to vector<16xf32>
    %45 = vector.shape_cast %44 : vector<16xf32> to vector<16x1xf32>
    %cst_18 = arith.constant 2.000000e+00 : f32
    %46 = vector.broadcast %cst_18 : f32 to vector<16x1xf32>
    %47 = arith.mulf %46, %45 : vector<16x1xf32>
    %48 = arith.addf %22, %7 : vector<16x256xf32>
    %cst_19 = arith.constant dense<0.000000e+00> : vector<16xf32>
    %49 = vector.multi_reduction <add>, %48, %cst_19 [1] : vector<16x256xf32> to vector<16xf32>
    %50 = vector.shape_cast %49 : vector<16xf32> to vector<16x1xf32>
    %cst_20 = arith.constant 1.000000e+00 : f32
    %51 = vector.broadcast %cst_20 : f32 to vector<16x1xf32>
    %52 = arith.addf %47, %51 : vector<16x1xf32>
    %cst_21 = arith.constant 1.000000e+00 : f32
    %53 = vector.broadcast %cst_21 : f32 to vector<16x1xf32>
    %54 = arith.addf %50, %53 : vector<16x1xf32>
    %55 = arith.divf %52, %54 : vector<16x1xf32>
    %cst_22 = arith.constant 1.000000e+00 : f32
    %56 = vector.broadcast %cst_22 : f32 to vector<16x1xf32>
    %57 = arith.subf %56, %55 : vector<16x1xf32>
    %58 = vector.shape_cast %57 : vector<16x1xf32> to vector<1x16x1xf32>
    %cst_23 = arith.constant dense<0.000000e+00> : vector<1xf32>
    %59 = vector.multi_reduction <add>, %58, %cst_23 [1, 2] : vector<1x16x1xf32> to vector<1xf32>
    %60 = vector.shape_cast %59 : vector<1xf32> to vector<1x1x1xf32>
    %61 = vector.extract %60[0, 0, 0] : f32 from vector<1x1x1xf32>
    %c0_24 = arith.constant 0 : index
    %c0_25 = arith.constant 0 : index
    %62 = vector.load %arg9[%c0_24, %c0_25] : memref<1x128xf32, #tpu.memory_space<vmem>>, vector<1x128xf32>
    %c3_i32 = arith.constant 3 : i32
    %63 = vector.broadcast %c3_i32 : i32 to vector<1x128xi32>
    %64 = arith.cmpi eq, %0, %63 : vector<1x128xi32>
    %cst_26 = arith.constant 0.000000e+00 : f32
    %65 = vector.broadcast %42 : f32 to vector<1x128xf32>
    %66 = vector.broadcast %cst_26 : f32 to vector<1x128xf32>
    %67 = arith.select %64, %65, %66 : vector<1x128xi1>, vector<1x128xf32>
    %c4_i32 = arith.constant 4 : i32
    %68 = vector.broadcast %c4_i32 : i32 to vector<1x128xi32>
    %69 = arith.cmpi eq, %0, %68 : vector<1x128xi32>
    %cst_27 = arith.constant 0.000000e+00 : f32
    %70 = vector.broadcast %61 : f32 to vector<1x128xf32>
    %71 = vector.broadcast %cst_27 : f32 to vector<1x128xf32>
    %72 = arith.select %69, %70, %71 : vector<1x128xi1>, vector<1x128xf32>
    %73 = arith.addf %67, %72 : vector<1x128xf32>
    %74 = arith.addf %62, %73 : vector<1x128xf32>
    %c0_28 = arith.constant 0 : index
    %c0_29 = arith.constant 0 : index
    %75 = vector.load %arg9[%c0_28, %c0_29] : memref<1x128xf32, #tpu.memory_space<vmem>>, vector<1x128xf32>
    tpu.vector_store %arg9[%c0_28, %c0_29], %74 {strides = array<i32>} : memref<1x128xf32, #tpu.memory_space<vmem>>, vector<1x128xf32>,
    %c0_i32_30 = arith.constant 0 : i32
    %76 = arith.cmpi eq, %arg0, %c0_i32_30 : i32
    %77 = arith.extui %76 : i1 to i32
    %c0_i32_31 = arith.constant 0 : i32
    %78 = arith.cmpi ne, %77, %c0_i32_31 : i32
    scf.if %78 {
      %c0_32 = arith.constant 0 : index
      %c0_33 = arith.constant 0 : index
      %79 = vector.load %arg9[%c0_32, %c0_33] : memref<1x128xf32, #tpu.memory_space<vmem>>, vector<1x128xf32>
      %c3_i32_34 = arith.constant 3 : i32
      %80 = vector.broadcast %c3_i32_34 : i32 to vector<1x128xi32>
      %81 = arith.cmpi eq, %0, %80 : vector<1x128xi32>
      %cst_35 = arith.constant 3.906250e-03 : f32
      %cst_36 = arith.constant 1.000000e+00 : f32
      %82 = vector.broadcast %cst_35 : f32 to vector<1x128xf32>
      %83 = vector.broadcast %cst_36 : f32 to vector<1x128xf32>
      %84 = arith.select %81, %82, %83 : vector<1x128xi1>, vector<1x128xf32>
      %85 = arith.mulf %79, %84 : vector<1x128xf32>
      %c0_37 = arith.constant 0 : index
      %c0_38 = arith.constant 0 : index
      %86 = vector.load %arg8[%c0_37, %c0_38] : memref<1x128xf32, #tpu.memory_space<vmem>>, vector<1x128xf32>
      tpu.vector_store %arg8[%c0_37, %c0_38], %85 {strides = array<i32>} : memref<1x128xf32, #tpu.memory_space<vmem>>, vector<1x128xf32>,
    } else {
    }
    return
  }
  func.func @transform_0(%arg0: i32) -> (i32, i32) {
    %c0_i32 = arith.constant 0 : i32
    %c0_i32_0 = arith.constant 0 : i32
    %c0_i32_1 = arith.constant 0 : i32
    return %c0_i32, %c0_i32_0 : i32, i32
  }
  func.func @transform_1(%arg0: i32) -> (i32, i32) {
    %c0_i32 = arith.constant 0 : i32
    %c0_i32_0 = arith.constant 0 : i32
    %c0_i32_1 = arith.constant 0 : i32
    return %c0_i32, %c0_i32_0 : i32, i32
  }
  func.func @transform_2(%arg0: i32) -> (i32, i32) {
    %c0_i32 = arith.constant 0 : i32
    %c0_i32_0 = arith.constant 0 : i32
    %c0_i32_1 = arith.constant 0 : i32
    return %c0_i32, %c0_i32_0 : i32, i32
  }
  func.func @transform_3(%arg0: i32) -> (i32, i32) {
    %c0_i32 = arith.constant 0 : i32
    %c0_i32_0 = arith.constant 0 : i32
    %c0_i32_1 = arith.constant 0 : i32
    return %c0_i32, %c0_i32_0 : i32, i32
  }
  func.func @transform_4(%arg0: i32) -> (i32, i32) {
    %c0_i32 = arith.constant 0 : i32
    %c0_i32_0 = arith.constant 0 : i32
    %c0_i32_1 = arith.constant 0 : i32
    return %c0_i32, %c0_i32_0 : i32, i32
  }
  func.func @transform_5(%arg0: i32) -> (i32, i32) {
    %c0_i32 = arith.constant 0 : i32
    %c0_i32_0 = arith.constant 0 : i32
    return %arg0, %c0_i32 : i32, i32
  }
  func.func @transform_6(%arg0: i32) -> (i32, i32) {
    %c0_i32 = arith.constant 0 : i32
    %c0_i32_0 = arith.constant 0 : i32
    return %arg0, %c0_i32 : i32, i32
  }
  func.func @transform_7(%arg0: i32) -> (i32, i32) {
    %c0_i32 = arith.constant 0 : i32
    %c0_i32_0 = arith.constant 0 : i32
    %c0_i32_1 = arith.constant 0 : i32
    return %c0_i32, %c0_i32_0 : i32, i32
  }
}

</mosaic_0001>

<bundles_post_ra>
// kernel: tpu_custom_call.1
= control target key start
LH: loop header
LB: loop body
LE: loop exit
PB: predicated region body
PF: predicated region fallthrough
CT: control target
= control target key end

     0   :  { %12 = vsyncpa [#allocation4], 0  ;;  %s1052_s0 = inlined_call_operand.hbm [shape: f32[4,32], index: 0, kind: input, shape index: {}]   ;;  %s1053_s1 = inlined_call_operand.vmem [shape: s32[1,32], index: 1, kind: input, shape index: {}]   ;;  %s1054_s2 = inlined_call_operand.vmem [shape: f32[4,16], index: 2, kind: input, shape index: {}]   ;;  %s1055_s3 = inlined_call_operand.hbm [shape: f32[4,16], index: 3, kind: input, shape index: {}]   ;;  %s1056_s4 = inlined_call_operand.hbm [shape: f32[64,256], index: 4, kind: input, shape index: {}]   ;;  %s1057_s5 = inlined_call_operand.hbm [shape: bf16[16,64], index: 5, kind: input, shape index: {}]   ;;  %s1058_s6 = inlined_call_operand.vmem [shape: bf16[16,256], index: 6, kind: input, shape index: {}]   ;;  %s1059_s7 = inlined_call_operand.hbm [shape: f32[1,128], index: 7, kind: output, shape index: {}]  }
   0x1   :  { %13 = vsyncpa [#allocation7], 0 }
   0x2   :  { %14 = vsyncpa [#allocation10], 0 }
   0x3   :  { %15 = vsyncpa [#allocation5], 0  ;;  %s745_s24 = smov [#allocation6]   ;;  %s746_s26 = smov [#allocation3]  }
   0x4   :  { %s36_s25 = sshll.u32 %s745_s24, 4  ;;  %s22_s27 = sshll.u32 %s746_s26, 4  ;;  %s37_s25 = int_to_ptr.vmem [resolvable:$true] %s36_s25  ;;  %s23_s27 = int_to_ptr.vmem [resolvable:$true] %s22_s27 }
   0x5   :  { %s627_s30 = scalar_lea.hbm %s1055_s3, 64 }
   0x6   :  { %p628_p0 = scmp.ne.s32.totalorder %s1055_s3, %s627_s30  ;;  %p631_p1 = scmp.lt.u32.totalorder %s627_s30, %s1055_s3 }
   0x8   :  { %p633_p2 = pnand %p631_p1, %p628_p0 }
   0xa   :  { %636 = shalt.err (!%p633_p2)
}
   0xb   :  { %s637_s12 = scalar_lea.vmem %s37_s25, 64  ;;  %p642_p4 = scmp.lt.s32.totalorder %s37_s25, %s37_s25 }
   0xc   :  { %p638_p3 = scmp.ne.s32.totalorder %s37_s25, %s637_s12  ;;  %p643_p5 = scmp.lt.s32.totalorder %s637_s12, %s637_s12 }
   0xe   :  { %p644_p6 = por %p643_p5, %p642_p4 }
  0x10   :  { %p645_p7 = pnand %p644_p6, %p638_p3 }
  0x12   :  { %648 = shalt.err (!%p645_p7)
}
  0x13   :  { %39 = dma.hbm_to_vmem [thread:$0]  %s1055_s3, 64, %s37_s25, [#allocation7]  }
  0x14   :  { %s649_s17 = scalar_lea.hbm %s1052_s0, 64 }
  0x15   :  { %p650_p8 = scmp.ne.s32.totalorder %s1052_s0, %s649_s17  ;;  %p653_p9 = scmp.lt.u32.totalorder %s649_s17, %s1052_s0 }
  0x17   :  { %p655_p10 = pnand %p653_p9, %p650_p8 }
  0x19   :  { %658 = shalt.err (!%p655_p10)
}
  0x1a   :  { %s659_s22 = scalar_lea.vmem %s23_s27, 64  ;;  %p664_p12 = scmp.lt.s32.totalorder %s23_s27, %s23_s27 }
  0x1b   :  { %p660_p11 = scmp.ne.s32.totalorder %s23_s27, %s659_s22  ;;  %p665_p13 = scmp.lt.s32.totalorder %s659_s22, %s659_s22 }
  0x1d   :  { %p666_p0 = por %p665_p13, %p664_p12 }
  0x1f   :  { %p667_p1 = pnand %p666_p0, %p660_p11 }
  0x21   :  { %670 = shalt.err (!%p667_p1)
}
  0x22   :  { %25 = dma.hbm_to_vmem [thread:$0]  %s1052_s0, 64, %s23_s27, [#allocation4]  }
  0x23   :  { %s747_s24 = smov [#allocation8]   ;;  %s671_s29 = scalar_lea.hbm %s1056_s4, 2048 }
  0x24   :  { %s45_s25 = sshll.u32 %s747_s24, 4  ;;  %p672_p2 = scmp.ne.s32.totalorder %s1056_s4, %s671_s29  ;;  %s46_s25 = int_to_ptr.vmem [resolvable:$true] %s45_s25 }
  0x25   :  { %p675_p3 = scmp.lt.u32.totalorder %s671_s29, %s1056_s4 }
  0x27   :  { %p677_p4 = pnand %p675_p3, %p672_p2 }
  0x29   :  { %680 = shalt.err (!%p677_p4)
}
  0x2a   :  { %s681_s11 = scalar_lea.vmem %s46_s25, 2048  ;;  %p686_p6 = scmp.lt.s32.totalorder %s46_s25, %s46_s25 }
  0x2b   :  { %p682_p5 = scmp.ne.s32.totalorder %s46_s25, %s681_s11  ;;  %p687_p7 = scmp.lt.s32.totalorder %s681_s11, %s681_s11 }
  0x2d   :  { %p688_p8 = por %p687_p7, %p686_p6 }
  0x2f   :  { %p689_p9 = pnand %p688_p8, %p682_p5 }
  0x31   :  { %692 = shalt.err (!%p689_p9)
}
  0x32   :  { %s748_s0 = smov 256   ;;  %s749_s27 = smov 16  }
  0x33   :  { %51 = dma.hbm_to_vmem [thread:$0]  %s1056_s4, 2048, %s46_s25, [#allocation7], %s748_s0, %s748_s0, %s749_s27  }
  0x34   :  { %s750_s14 = smov [#allocation9]   ;;  %s693_s18 = scalar_lea.hbm %s1057_s5, 128 }
  0x35   :  { %s57_s15 = sshll.u32 %s750_s14, 4  ;;  %p694_p10 = scmp.ne.s32.totalorder %s1057_s5, %s693_s18  ;;  %s58_s15 = int_to_ptr.vmem [resolvable:$true] %s57_s15 }
  0x36   :  { %p697_p11 = scmp.lt.u32.totalorder %s693_s18, %s1057_s5 }
  0x38   :  { %p699_p12 = pnand %p697_p11, %p694_p10 }
  0x3a   :  { %702 = shalt.err (!%p699_p12)
}
  0x3b   :  { %s703_s3 = scalar_lea.vmem %s58_s15, 128  ;;  %p708_p0 = scmp.lt.s32.totalorder %s58_s15, %s58_s15 }
  0x3c   :  { %p704_p13 = scmp.ne.s32.totalorder %s58_s15, %s703_s3  ;;  %p709_p1 = scmp.lt.s32.totalorder %s703_s3, %s703_s3 }
  0x3e   :  { %p710_p2 = por %p709_p1, %p708_p0 }
  0x40   :  { %p711_p3 = pnand %p710_p2, %p704_p13 }
  0x42   :  { %714 = shalt.err (!%p711_p3)
}
  0x43   :  { %s751_s4 = smov 64   ;;  %s752_s23 = smov 4  }
  0x44   :  { %63 = dma.hbm_to_vmem [thread:$0]  %s1057_s5, 128, %s58_s15, [#allocation10], %s751_s4, %s751_s4, %s752_s23  }
  0x45   :  { %737 = dma.done.wait [#allocation4], 64  }
  0x46   :  { %738 = vsyncadd [#allocation4], 4294967232 }
  0x47   :  { %739 = dma.done.wait [#allocation7], 2112  }
  0x48   :  { %740 = vsyncadd [#allocation7], 4294965184 }
  0x49   :  { %741 = dma.done.wait [#allocation10], 128  }
  0x4a   :  { %742 = vsyncadd [#allocation10], 4294967168  ;;  %v753_v0 = vmov 0.0   ;;  %v230_v1 = vld [vmem:[#allocation8 + $0x8] sm:$0xff]  ;;  %v232_v2 = vld [vmem:[#allocation8 + $0x18] sm:$0xff]  ;;  %vm245_vm0 = vcmask 523264   ;;  %v78_v61 = vlaneseq }
  0x4b   :  { %316 = vmatprep.mubr.f32.mxu0 %v753_v0  ;;  %322 = vmatprep.mubr.f32.mxu1 %v753_v0  ;;  %v229_v3 = vld [vmem:[#allocation8] sm:$0xff]  ;;  %v543_v4 = vpack.c.bf16 %v232_v2, %v230_v1  ;;  %v231_v5 = vld [vmem:[#allocation8 + $0x10] sm:$0xff]  ;;  %v234_v6 = vld [vmem:[#allocation8 + $0x28] sm:$0xff]  ;;  %s756_s12 = smov [#allocation11]  }
  0x4c   :  { %v236_v7 = vld [vmem:[#allocation8 + $0x38] sm:$0xff]  ;;  %v545_v8 = vpack.c.bf16 %v231_v5, %v229_v3  ;;  %v233_v10 = vld [vmem:[#allocation8 + $0x20] sm:$0xff]  ;;  %v235_v11 = vld [vmem:[#allocation8 + $0x30] sm:$0xff]  ;;  %v87_v1 = vshrl.u32 %v78_v61, 7  ;;  %s525_s13 = sshll.u32 %s756_s12, 4  ;;  %s526_s13 = int_to_ptr.vmem [resolvable:$true] %s525_s13 }
  0x4d   :  { %v547_v9 = vpack.c.bf16 %v236_v7, %v234_v6  ;;  %v238_v12 = vld [vmem:[#allocation8 + $0x48] sm:$0xff]  ;;  %544 = vmatprep.subr.bf16.mxu0 %v543_v4  ;;  %559 = vmatprep.subr.bf16.mxu1 %v543_v4  ;;  %v240_v13 = vld [vmem:[#allocation8 + $0x58] sm:$0xff]  ;;  %v549_v14 = vpack.c.bf16 %v235_v11, %v233_v10  ;;  %v237_v16 = vld [vmem:[#allocation8 + $0x40] sm:$0xff]  ;;  %s715_s14 = scalar_lea.vmem %s526_s13, 16  ;;  %s719_s15 = scalar_lea.vmem %s526_s13, 32 }
  0x4e   :  { %546 = vmatpush1.bf16.msra.mxu0 %v545_v8  ;;  %563 = vmatpush1.bf16.msra.mxu1 %v545_v8  ;;  %v551_v15 = vpack.c.bf16 %v240_v13, %v238_v12  ;;  %v239_v17 = vld [vmem:[#allocation8 + $0x50] sm:$0xff]  ;;  %v242_v18 = vld [vmem:[#allocation8 + $0x68] sm:$0xff]  ;;  %v244_v19 = vld [vmem:[#allocation8 + $0x78] sm:$0xff]  ;;  %p716_p4 = scmp.ne.s32.totalorder %s526_s13, %s715_s14  ;;  %p720_p5 = scmp.lt.s32.totalorder %s526_s13, %s526_s13 }
  0x4f   :  { %548 = vmatprep.subr.bf16.mxu0 %v547_v9  ;;  %560 = vmatprep.subr.bf16.mxu1 %v547_v9  ;;  %v553_v20 = vpack.c.bf16 %v239_v17, %v237_v16  ;;  %v555_v21 = vpack.c.bf16 %v244_v19, %v242_v18  ;;  %v241_v22 = vld [vmem:[#allocation8 + $0x60] sm:$0xff]  ;;  %v243_v23 = vld [vmem:[#allocation8 + $0x70] sm:$0xff]  ;;  %v845_v28 = vld [vmem:[#allocation3] sm:$0xf]  ;;  %p721_p6 = scmp.lt.s32.totalorder %s719_s15, %s715_s14 }
  0x50   :  { %v557_v24 = vpack.c.bf16 %v243_v23, %v241_v22  ;;  %v540_v25 = vld [vmem:[#allocation9] sm:$0xff]   ;;  %v852_v30 = vld [vmem:[#allocation6] sm:$0xf]  ;;  %v93_v31 = vand.u32 2147483647, %v845_v28  ;;  %vm97_vm1 = vcmp.ge.f32.partialorder %v845_v28, 0.0 }
  0x51   :  { %v541_v26 = vunpack.c.l.bf16 %v540_v25  ;;  %v542_v27 = vunpack.c.h.bf16 %v540_v25  ;;  %v850_v29 = vld [vmem:[%s1054_s2] sm:$0xf]  ;;  %v154_v33 = vmul.f32 0.5, %v852_v30  ;;  %v102_v19 = vmax.f32 %v845_v28, 0.0  ;;  %p722_p7 = por %p721_p6, %p720_p5 }
  0x52   :  { %550 = vmatpush1.bf16.msra.mxu0 %v549_v14  ;;  %564 = vmatpush1.bf16.msra.mxu1 %v549_v14  ;;  %v148_v32 = vmul.f32 0.5, %v850_v29  ;;  %v94_v34 = vsub.f32 0.0, %v93_v31  ;;  %v536_v3 = vld [vmem:[%s1053_s1] ss:$0 sm:$0xff] }
  0x53   :  { %552 = vmatprep.subr.bf16.mxu0 %v551_v15  ;;  %561 = vmatprep.subr.bf16.mxu1 %v551_v15  ;;  %v156_v36 = vrot.slane %v154_v33, 2  ;;  %vm92_vm2 = vcmp.eq.s32.totalorder %v87_v1, %v536_v3  ;;  %p723_p8 = pnand %p722_p7, %p716_p4 }
  0x54   :  { %v150_v35 = vrot.slane %v148_v32, 2  ;;  %v95_v37 = vmul.f32 1.442695, %v94_v34 }
  0x55   :  { %v158_v40 = vsub.f32 %v852_v30, %v156_v36  ;;  %v159_v41 = vadd.f32 %v156_v36, %v852_v30 }
  0x56   :  { %554 = vmatpush1.bf16.msra.mxu0 %v553_v20  ;;  %565 = vmatpush1.bf16.msra.mxu1 %v553_v20  ;;  %v152_v38 = vsub.f32 %v850_v29, %v150_v35  ;;  %v153_v39 = vadd.f32 %v150_v35, %v850_v29  ;;  %589 = vpow2.f32 %v95_v37 }
  0x57   :  { %556 = vmatprep.subr.bf16.mxu0 %v555_v21  ;;  %562 = vmatprep.subr.bf16.mxu1 %v555_v21  ;;  %v165_v45 = vsub.f32 %v159_v41, %v158_v40  ;;  %v103_v21 = vsel %vm92_vm2, %v845_v28, 0.0  ;;  %v223_v28 = vld [vmem:[%s1058_s6] sm:$0xff] }
  0x58   :  { %v170_v42 = vmin.f32 %v153_v39, %v159_v41  ;;  %v171_v43 = vmax.f32 %v152_v38, %v158_v40  ;;  %v160_v44 = vsub.f32 %v153_v39, %v152_v38  ;;  %v183_v51 = vmax.f32 %v153_v39, %v159_v41 }
  0x59   :  { %v167_v49 = vrot.slane %v165_v45, 1  ;;  %v184_v52 = vmin.f32 %v152_v38, %v158_v40  ;;  %v104_v34 = vsub.f32 %v102_v19, %v103_v21  ;;  %v224_v38 = vld [vmem:[%s1058_s6 + $0x8] sm:$0xff] }
  0x5a   :  { %558 = vmatpush1.bf16.msra.mxu0 %v557_v24  ;;  %566 = vmatpush1.bf16.msra.mxu1 %v557_v24  ;;  %v172_v46 = vsub.f32 %v170_v42, %v171_v43  ;;  %v162_v48 = vrot.slane %v160_v44, 1 }
  0x5b   :  { %v169_v55 = vmul.f32 %v167_v49, %v165_v45  ;;  %v185_v57 = vsub.f32 %v183_v51, %v184_v52  ;;  %v897_v45 = vunpack.c.l.bf16 %v224_v38 }
  0x5c   :  { %v173_v50 = vmax.f32 %v172_v46, 0.0  ;;  %v164_v54 = vmul.f32 %v162_v48, %v160_v44  ;;  %v895_v44 = vunpack.c.l.bf16 %v223_v28  ;;  %v899_v46 = vunpack.c.h.bf16 %v223_v28 }
  0x5d   :  { %537 = vmatmul.mubr.msk.f32.vlgmr.msra.gmra.mrb[0].mxu0 %vm245_vm0, %v541_v26  ;;  %538 = vmatmul.mubr.msk.f32.vlgmr.msra.gmra.mrb[0].mxu1 %vm245_vm0, %v542_v27  ;;  %v187_v60 = vrot.slane %v185_v57, 1  ;;  %vm331_vm5 = vcmp.gt.f32.partialorder %v897_v45, 0.5  ;;  %vm121_vm0 = vcmask 257024  }
  0x5e   :  { %v175_v56 = vrot.slane %v173_v50, 1  ;;  %v178_v59 = vadd.f32 %v169_v55, %v164_v54  ;;  %vm329_vm4 = vcmp.gt.f32.partialorder %v895_v44, 0.5  ;;  %vm330_vm6 = vcmp.gt.f32.partialorder %v899_v46, 0.5 }
  0x5f   :  { %v189_v63 = vmul.f32 %v187_v60, %v185_v57 }
  0x60   :  { %v590_v47 = vpop.eup %589  ;;  %v861_v58 = vmul.f32 %v175_v56, %v173_v50  ;;  %v754_v50 = vmov 0.75  }
  0x61   :  { %v99_v53 = vadd.f32 1.0, %v590_v47  ;;  %v108_v0 = vmul.f32 -0.5, %v590_v47  ;;  %v98_v4 = vsel %vm97_vm1, 1.0, %v590_v47  ;;  %v191_v6 = vmax.f32 %v189_v63, 1e-07 }
  0x62   :  { %v864_v62 = vsub.f32 %v178_v59, %v861_v58  ;;  %v111_v16 = vand.u32 2147483647, %v590_v47  ;;  %v119_v51 = vsel %vm92_vm2, 0.25, %v754_v50  ;;  %v135_v59 = vsub.f32 %v850_v29, %v852_v30 }
  0x63   :  { %591 = vrcp.f32 %v99_v53  ;;  %v109_v9 = vadd.f32 1.0, %v108_v0  ;;  %vm137_vm1 = vcmask 125952  }
  0x64   :  { %593 = vlog2.f32 %v99_v53  ;;  %v180_v5 = vmax.f32 %v864_v62, 1e-07  ;;  %vm112_vm3 = vcmp.lt.f32.partialorder %v111_v16, 0.0004427343  ;;  %v190_v43 = vsub.f32 %v189_v63, %v864_v62 }
  0x65   :  { %v110_v23 = vmul.f32 %v590_v47, %v109_v9  ;;  %v901_v47 = vunpack.c.h.bf16 %v224_v38  ;;  %v935_v63 = vsel %vm329_vm4, 0.25, %v754_v50 }
  0x66   :  { %595 = vrcp.f32 %v180_v5 }
  0x67   :  { %597 = vrcp.f32 %v191_v6  ;;  %vm332_vm7 = vcmp.gt.f32.partialorder %v901_v47, 0.5 }
  0x68   :  { %v440_v29 = vsel %vm332_vm7, 0.25, %v754_v50 }
  0x6d   :  { %v592_v2 = vpop.eup %591 }
  0x6e   :  { %v594_v10 = vpop.eup %593  ;;  %v101_v13 = vmul.f32 %v592_v2, %v98_v4 }
  0x6f   :  { %v107_v22 = vmul.f32 0.6931472, %v594_v10 }
  0x70   :  { %v115_v27 = vsub.f32 1.0, %v101_v13  ;;  %v596_v39 = vpop.eup %595 }
  0x71   :  { %v113_v36 = vsel %vm112_vm3, %v110_v23, %v107_v22  ;;  %v598_v42 = vpop.eup %597  ;;  %v908_v52 = vmul.f32 %v596_v39, %v861_v58  ;;  %v924_v58 = vsel %vm330_vm6, 0.25, %v754_v50  ;;  %vm489_vm3 = vcmask 7168  }
  0x72   :  { %v116_v37 = vsel %vm92_vm2, %v115_v27, %v101_v13  ;;  %v114_v40 = vadd.f32 %v113_v36, %v104_v34  ;;  %v910_v53 = vmul.f32 %v598_v42, %v190_v43  ;;  %vm196_vm2 = vcmask 122880  }
  0x73   :  { %v117_v41 = vmul.f32 %v116_v37, %v116_v37 }
  0x74   :  { %v194_v3 = vsub.f32 %v908_v52, %v910_v53 }
  0x75   :  { %v118_v48 = vmul.f32 %v117_v41, %v114_v40 }
  0x77   :  { %v930_v62 = vmul.f32 %v119_v51, %v118_v48 }
 0x130   :  { %v872_v7 = vpop.f32.mrb[0].mxu0  ;;  %v874_v8 = vpop.f32.mrb[0].mxu1 }
 0x131   :  { %v333_v11 = vand.u32 2147483647, %v872_v7  ;;  %v877_v12 = vpop.f32.mrb[1].mxu0  ;;  %v335_v14 = vand.u32 2147483647, %v874_v8  ;;  %v880_v15 = vpop.f32.mrb[1].mxu1 }
 0x132   :  { %v334_v18 = vand.u32 2147483647, %v877_v12  ;;  %v336_v26 = vand.u32 2147483647, %v880_v15  ;;  %v369_v60 = vmax.f32 %v872_v7, 0.0  ;;  %v373_v1 = vsel %vm329_vm4, %v872_v7, 0.0 }
 0x133   :  { %v337_v17 = vsub.f32 0.0, %v333_v11  ;;  %v339_v20 = vsub.f32 0.0, %v335_v14  ;;  %vm349_vm8 = vcmp.ge.f32.partialorder %v872_v7, 0.0  ;;  %vm351_vm9 = vcmp.ge.f32.partialorder %v874_v8, 0.0 }
 0x134   :  { %v338_v25 = vsub.f32 0.0, %v334_v18  ;;  %v340_v33 = vsub.f32 0.0, %v336_v26  ;;  %v371_v4 = vmax.f32 %v874_v8, 0.0  ;;  %v375_v6 = vsel %vm331_vm5, %v874_v8, 0.0 }
 0x135   :  { %v341_v24 = vmul.f32 1.442695, %v337_v17  ;;  %v345_v31 = vmul.f32 1.442695, %v339_v20  ;;  %v377_v10 = vsub.f32 %v369_v60, %v373_v1  ;;  %v370_v13 = vmax.f32 %v877_v12, 0.0 }
 0x136   :  { %v343_v32 = vmul.f32 1.442695, %v338_v25  ;;  %v347_v35 = vmul.f32 1.442695, %v340_v33  ;;  %v374_v14 = vsel %vm330_vm6, %v877_v12, 0.0  ;;  %v372_v17 = vmax.f32 %v880_v15, 0.0 }
 0x137   :  { %599 = vpow2.f32 %v341_v24  ;;  %v376_v19 = vsel %vm332_vm7, %v880_v15, 0.0  ;;  %vm350_vm10 = vcmp.ge.f32.partialorder %v877_v12, 0.0  ;;  %v379_v23 = vsub.f32 %v371_v4, %v375_v6 }
 0x138   :  { %601 = vpow2.f32 %v345_v31  ;;  %vm352_vm11 = vcmp.ge.f32.partialorder %v880_v15, 0.0  ;;  %v378_v26 = vsub.f32 %v370_v13, %v374_v14  ;;  %v965_v31 = vsub.f32 %v372_v17, %v376_v19 }
 0x139   :  { %603 = vpow2.f32 %v343_v32  ;;  %v439_v8 = vsel %vm331_vm5, 0.25, %v754_v50 }
 0x13a   :  { %605 = vpow2.f32 %v347_v35 }
 0x141   :  { %v903_v49 = vpop.eup %599 }
 0x142   :  { %v912_v54 = vpop.eup %601  ;;  %v357_v55 = vadd.f32 1.0, %v903_v49  ;;  %v384_v5 = vmul.f32 -0.5, %v903_v49  ;;  %v387_v18 = vand.u32 2147483647, %v903_v49  ;;  %v353_v34 = vsel %vm349_vm8, 1.0, %v903_v49 }
 0x143   :  { %v918_v56 = vpop.eup %603  ;;  %v359_v57 = vadd.f32 1.0, %v912_v54  ;;  %v402_v11 = vmul.f32 -0.5, %v912_v54  ;;  %v405_v22 = vand.u32 2147483647, %v912_v54  ;;  %v355_v36 = vsel %vm351_vm9, 1.0, %v912_v54 }
 0x144   :  { %607 = vrcp.f32 %v357_v55  ;;  %v606_v0 = vpop.eup %605  ;;  %v358_v2 = vadd.f32 1.0, %v918_v56  ;;  %v393_v16 = vmul.f32 -0.5, %v918_v56  ;;  %v385_v21 = vadd.f32 1.0, %v384_v5 }
 0x145   :  { %609 = vlog2.f32 %v357_v55  ;;  %v360_v9 = vadd.f32 1.0, %v606_v0  ;;  %v411_v20 = vmul.f32 -0.5, %v606_v0  ;;  %v403_v24 = vadd.f32 1.0, %v402_v11 }
 0x146   :  { %611 = vrcp.f32 %v359_v57  ;;  %v396_v25 = vand.u32 2147483647, %v918_v56  ;;  %v394_v27 = vadd.f32 1.0, %v393_v16  ;;  %v414_v32 = vand.u32 2147483647, %v606_v0 }
 0x147   :  { %613 = vlog2.f32 %v359_v57  ;;  %vm970_vm12 = vcmp.lt.f32.partialorder %v387_v18, 0.0004427343  ;;  %v412_v37 = vadd.f32 1.0, %v411_v20  ;;  %v386_v39 = vmul.f32 %v903_v49, %v385_v21 }
 0x148   :  { %615 = vrcp.f32 %v358_v2  ;;  %vm978_vm13 = vcmp.lt.f32.partialorder %v405_v22, 0.0004427343  ;;  %v354_v7 = vsel %vm350_vm10, 1.0, %v918_v56  ;;  %v404_v43 = vmul.f32 %v912_v54, %v403_v24 }
 0x149   :  { %617 = vlog2.f32 %v358_v2  ;;  %vm986_vm14 = vcmp.lt.f32.partialorder %v396_v25, 0.0004427343  ;;  %v356_v48 = vsel %vm352_vm11, 1.0, %v606_v0  ;;  %v395_v57 = vmul.f32 %v918_v56, %v394_v27 }
 0x14a   :  { %619 = vrcp.f32 %v360_v9  ;;  %vm993_vm15 = vcmp.lt.f32.partialorder %v414_v32, 0.0004427343  ;;  %v413_v2 = vmul.f32 %v606_v0, %v412_v37 }
 0x14b   :  { %621 = vlog2.f32 %v360_v9 }
 0x14e   :  { %v608_v33 = vpop.eup %607 }
 0x14f   :  { %v610_v28 = vpop.eup %609  ;;  %v362_v38 = vmul.f32 %v608_v33, %v353_v34 }
 0x150   :  { %v612_v41 = vpop.eup %611  ;;  %v383_v42 = vmul.f32 0.6931472, %v610_v28 }
 0x151   :  { %v614_v49 = vpop.eup %613  ;;  %v421_v51 = vsub.f32 1.0, %v362_v38  ;;  %v366_v55 = vmul.f32 %v612_v41, %v355_v36  ;;  %v469_v4 = vadd.f32 %v362_v38, %v895_v44  ;;  %v457_v56 = vmul.f32 %v362_v38, %v895_v44 }
 0x152   :  { %v616_v12 = vpop.eup %615  ;;  %v389_v54 = vsel %vm970_vm12, %v386_v39, %v383_v42  ;;  %v401_v1 = vmul.f32 0.6931472, %v614_v49 }
 0x153   :  { %v618_v15 = vpop.eup %617  ;;  %v417_v5 = vadd.f32 %v389_v54, %v377_v10  ;;  %v425_v6 = vsel %vm329_vm4, %v421_v51, %v362_v38  ;;  %v364_v9 = vmul.f32 %v616_v12, %v354_v7  ;;  %v471_v17 = vadd.f32 %v366_v55, %v897_v45 }
 0x154   :  { %v620_v11 = vpop.eup %619  ;;  %v429_v13 = vmul.f32 %v425_v6, %v425_v6  ;;  %v407_v14 = vsel %vm978_vm13, %v404_v43, %v401_v1  ;;  %v392_v16 = vmul.f32 0.6931472, %v618_v15  ;;  %v459_v20 = vmul.f32 %v366_v55, %v897_v45 }
 0x155   :  { %v622_v0 = vpop.eup %621  ;;  %v422_v18 = vsub.f32 1.0, %v364_v9  ;;  %v368_v19 = vmul.f32 %v620_v11, %v356_v48  ;;  %v470_v10 = vadd.f32 %v364_v9, %v899_v46  ;;  %v458_v22 = vmul.f32 %v364_v9, %v899_v46 }
 0x156   :  { %v398_v21 = vsel %vm986_vm14, %v395_v57, %v392_v16  ;;  %v410_v44 = vmul.f32 0.6931472, %v622_v0  ;;  %v423_v24 = vsub.f32 1.0, %v366_v55  ;;  %v419_v28 = vadd.f32 %v407_v14, %v379_v23 }
 0x157   :  { %v418_v25 = vadd.f32 %v398_v21, %v378_v26  ;;  %v426_v27 = vsel %vm330_vm6, %v422_v18, %v364_v9  ;;  %v473_v32 = vadd.f32 %v470_v10, %v469_v4  ;;  %v472_v33 = vadd.f32 %v368_v19, %v901_v47 }
 0x158   :  { %v430_v34 = vmul.f32 %v426_v27, %v426_v27  ;;  %v416_v35 = vsel %vm993_vm15, %v413_v2, %v410_v44  ;;  %v461_v36 = vadd.f32 %v458_v22, %v457_v56  ;;  %v460_v37 = vmul.f32 %v368_v19, %v901_v47 }
 0x159   :  { %474 = vadd.xlane.f32.xlu0 %v473_v32  ;;  %v476_v38 = vadd.f32 %v472_v33, %v471_v17  ;;  %v424_v39 = vsub.f32 1.0, %v368_v19  ;;  %v427_v26 = vsel %vm331_vm5, %v423_v24, %v366_v55  ;;  %v433_v41 = vmul.f32 %v429_v13, %v417_v5 }
 0x15a   :  { %v434_v40 = vmul.f32 %v430_v34, %v418_v25  ;;  %462 = vadd.xlane.f32.xlu1 %v461_v36  ;;  %v464_v46 = vadd.f32 %v460_v37, %v459_v20  ;;  %v431_v7 = vmul.f32 %v427_v26, %v427_v26  ;;  %v420_v42 = vadd.f32 %v416_v35, %v965_v31 }
 0x15b   :  { %v136_v43 = vand.u32 2147483647, %v135_v59  ;;  %v428_v23 = vsel %vm332_vm7, %v424_v39, %v368_v19  ;;  %v441_v51 = vmul.f32 %v935_v63, %v433_v41  ;;  %v122_v31 = vsel %vm121_vm0, %v930_v62, 0.0 }
 0x15c   :  { %v432_v48 = vmul.f32 %v428_v23, %v428_v23  ;;  %v435_v49 = vmul.f32 %v431_v7, %v419_v28  ;;  %v442_v55 = vmul.f32 %v924_v58, %v434_v40  ;;  %v195_v45 = vsub.f32 1.0, %v194_v3 }
 0x15d   :  { %477 = vadd.xlane.f32.xlu0 %v476_v38  ;;  %v138_v63 = vsel %vm137_vm1, %v136_v43, 0.0 }
 0x15e   :  { %465 = vadd.xlane.f32.xlu1 %v464_v46  ;;  %v436_v30 = vmul.f32 %v432_v48, %v420_v42  ;;  %v443_v59 = vmul.f32 %v439_v8, %v435_v49  ;;  %v445_v57 = vadd.f32 %v442_v55, %v441_v51  ;;  %v197_v12 = vsel %vm196_vm2, %v195_v45, 0.0 }
 0x15f   :  { %v79_v8 = vand.u32 127, %v78_v61 }
 0x160   :  { %v444_v58 = vmul.f32 %v440_v29, %v436_v30  ;;  %v446_v60 = vadd.f32 %v445_v57, %v443_v59 }
 0x161   :  { %123 = vadd.xlane.f32.xlu0 %v122_v31  ;;  %vm210_vm4 = vcmp.eq.s32.totalorder %v79_v8, 1  ;;  %vm207_vm5 = vcmp.eq.s32.totalorder %v79_v8, 0  ;;  %vm214_vm6 = vcmp.eq.s32.totalorder %v79_v8, 2  ;;  %vm503_vm7 = vcmp.eq.s32.totalorder %v79_v8, 3 }
 0x162   :  { %139 = vadd.xlane.f32.xlu1 %v138_v63  ;;  %v447_v62 = vadd.f32 %v446_v60, %v444_v58  ;;  %vm506_vm8 = vcmp.eq.s32.totalorder %v79_v8, 4 }
 0x165   :  { %198 = vadd.xlane.f32.xlu0 %v197_v12 }
 0x166   :  { %448 = vadd.xlane.f32.xlu1 %v447_v62 }
 0x1e6   :  { %v475_v47 = vpop.xlane.xlu0 %474 }
 0x1e7   :  { %v481_v50 = vadd.f32 1.0, %v475_v47  ;;  %v463_v54 = vpop.xlane.xlu1 %462 }
 0x1e8   :  { %v467_v52 = vmul.f32 2.0, %v463_v54 }
 0x1e9   :  { %623 = vrcp.f32 %v481_v50 }
 0x1ea   :  { %v478_v1 = vpop.xlane.xlu0 %477  ;;  %v479_v9 = vadd.f32 1.0, %v467_v52  ;;  %v755_v52 = vmov 1.0  }
 0x1eb   :  { %v482_v2 = vadd.f32 1.0, %v478_v1  ;;  %v466_v4 = vpop.xlane.xlu1 %465 }
 0x1ec   :  { %v468_v56 = vmul.f32 2.0, %v466_v4 }
 0x1ed   :  { %625 = vrcp.f32 %v482_v2 }
 0x1ee   :  { %v124_v53 = vpop.xlane.xlu0 %123  ;;  %v480_v44 = vadd.f32 1.0, %v468_v56 }
 0x1ef   :  { %v140_v3 = vpop.xlane.xlu1 %139  ;;  %v125_v15 = vrot.slane %v124_v53, 4 }
 0x1f0   :  { %v141_v5 = vrot.slane %v140_v3, 4 }
 0x1f1   :  { %v126_v6 = vadd.f32 %v125_v15, %v124_v53  ;;  %v516_v53 = vsel %vm503_vm7, 0.00390625, %v755_v52 }
 0x1f2   :  { %v142_v11 = vadd.f32 %v141_v5, %v140_v3  ;;  %v199_v13 = vpop.xlane.xlu0 %198 }
 0x1f3   :  { %v624_v14 = vpop.eup %623  ;;  %v127_v16 = vrot.slane %v126_v6, 2  ;;  %v449_v17 = vpop.xlane.xlu1 %448  ;;  %v200_v0 = vrot.slane %v199_v13, 4 }
 0x1f4   :  { %v484_v18 = vmul.f32 %v624_v14, %v479_v9  ;;  %v143_v19 = vrot.slane %v142_v11, 2  ;;  %v450_v10 = vrot.slane %v449_v17, 4 }
 0x1f5   :  { %v201_v20 = vadd.f32 %v200_v0, %v199_v13  ;;  %v128_v21 = vadd.f32 %v127_v16, %v126_v6 }
 0x1f6   :  { %v451_v22 = vadd.f32 %v450_v10, %v449_v17  ;;  %v144_v24 = vadd.f32 %v143_v19, %v142_v11  ;;  %v487_v33 = vsub.f32 1.0, %v484_v18 }
 0x1f7   :  { %v626_v25 = vpop.eup %625  ;;  %v202_v27 = vrot.slane %v201_v20, 2  ;;  %v129_v32 = vrot.slane %v128_v21, 1 }
 0x1f8   :  { %v486_v34 = vmul.f32 %v626_v25, %v480_v44  ;;  %v452_v35 = vrot.slane %v451_v22, 2  ;;  %v145_v36 = vrot.slane %v144_v24, 1  ;;  %v490_v46 = vsel %vm489_vm3, %v487_v33, 0.0 }
 0x1f9   :  { %v130_v37 = vadd.f32 %v129_v32, %v128_v21  ;;  %v203_v28 = vadd.f32 %v202_v27, %v201_v20 }
 0x1fa   :  { %v488_v38 = vsub.f32 1.0, %v486_v34  ;;  %v453_v39 = vadd.f32 %v452_v35, %v451_v22  ;;  %v146_v26 = vadd.f32 %v145_v36, %v144_v24 }
 0x1fb   :  { %567 = vpush %v130_v37  ;;  %v204_v40 = vrot.slane %v203_v28, 1 }
 0x1fc   :  { %v491_v7 = vsel %vm489_vm3, %v488_v38, 0.0  ;;  %569 = vpush %v146_v26  ;;  %v454_v41 = vrot.slane %v453_v39, 1 }
 0x1fd   :  { %v492_v42 = vadd.f32 %v491_v7, %v490_v46  ;;  %v205_v43 = vadd.f32 %v204_v40, %v203_v28 }
 0x1fe   :  { %v455_v23 = vadd.f32 %v454_v41, %v453_v39 }
 0x1ff   :  { %493 = vadd.xlane.f32.xlu0 %v492_v42  ;;  %571 = vpush %v205_v43 }
 0x200   :  { %573 = vpush %v455_v23 }
 0x22c   :  { %s568_s6 = spop %567 }
 0x22d   :  { %s132_s9 = smul.f32 0.25, %s568_s6  ;;  %s570_s10 = spop %569 }
 0x22e   :  { %v211_v48 = vstv %s570_s10 }
 0x22f   :  { %v208_v49 = vstv %s132_s9  ;;  %v212_v51 = vsel %vm210_vm4, %v211_v48, 0.0 }
 0x230   :  { %v209_v55 = vsel %vm207_vm5, %v208_v49, 0.0  ;;  %s572_s11 = spop %571 }
 0x231   :  { %v213_v31 = vadd.f32 %v212_v51, %v209_v55  ;;  %v215_v29 = vstv %s572_s11  ;;  %s574_s0 = spop %573 }
 0x232   :  { %v216_v30 = vsel %vm214_vm6, %v215_v29, 0.0  ;;  %v504_v12 = vstv %s574_s0 }
 0x233   :  { %v217_v59 = vadd.f32 %v216_v30, %v213_v31  ;;  %v505_v50 = vsel %vm503_vm7, %v504_v12, 0.0 }
 0x235   :  { %218 = vst [vmem:[#allocation2] sm:$0x1] %v217_v59 }
 0x23c   :  { %v502_v2 = vld [vmem:[#allocation2] sm:$0x1] }
 0x28c   :  { %v494_v57 = vpop.xlane.xlu0 %493 }
 0x28d   :  { %v495_v45 = vrot.slane %v494_v57, 4 }
 0x28f   :  { %v496_v63 = vadd.f32 %v495_v45, %v494_v57 }
 0x291   :  { %v497_v61 = vrot.slane %v496_v63, 2 }
 0x293   :  { %v498_v58 = vadd.f32 %v497_v61, %v496_v63 }
 0x295   :  { %v499_v60 = vrot.slane %v498_v58, 1 }
 0x297   :  { %v500_v62 = vadd.f32 %v499_v60, %v498_v58 }
 0x299   :  { %575 = vpush %v500_v62 }
 0x2ca   :  { %s576_s27 = spop %575 }
 0x2cb   :  { %v507_v47 = vstv %s576_s27 }
 0x2cc   :  { %v508_v54 = vsel %vm506_vm8, %v507_v47, 0.0 }
 0x2cd   :  { %v509_v1 = vadd.f32 %v508_v54, %v505_v50 }
 0x2cf   :  { %v510_v4 = vadd.f32 %v509_v1, %v502_v2 }
 0x2d1   :  { %511 = vst [vmem:[#allocation2] sm:$0x1] %v510_v4 }
 0x2d8   :  { %v515_v3 = vld [vmem:[#allocation2] sm:$0x1] }
 0x2d9   :  { %v517_v15 = vmul.f32 %v516_v53, %v515_v3 }
 0x2db   :  { %518 = vst [vmem:[#allocation11] sm:$0x1] %v517_v15 }
 0x2dc   :  { %726 = shalt.err (!%p723_p8)
}
 0x2dd   :  { %s727_s18 = scalar_lea.hbm %s1059_s7, 16 }
 0x2de   :  { %p728_p9 = scmp.ne.s32.totalorder %s1059_s7, %s727_s18  ;;  %p731_p10 = scmp.lt.u32.totalorder %s727_s18, %s1059_s7 }
 0x2e0   :  { %p733_p11 = pnand %p731_p10, %p728_p9 }
 0x2e2   :  { %736 = shalt.err (!%p733_p11)
}
 0x2e3   :  { %528 = dma.vmem_to_hbm [thread:$0]  %s526_s13, 16, %s1059_s7, [#allocation5]  }
 0x2e4   :  { %743 = dma.done.wait [#allocation5], 16  }
 0x2e5   :  { %744 = vsyncadd [#allocation5], 4294967280 }
 0x2e6   :  { %532 = vsyncpa [#allocation4], 1 }
 0x2e7   :  { %533 = vsyncpa [#allocation7], 1 }
 0x2e8   :  { %534 = vsyncpa [#allocation10], 1 }
 0x2e9   :  { %535 = vsyncpa [#allocation5], 1 }

</bundles_post_ra>
